<compile_context>
chip_gen: v5e
topology: v5e:2x2
jax: 0.10.0
libtpu: 0.0.40
codegen_flags: <defaults>
</compile_context>

<pallas_src>
import jax
import jax.numpy as jnp
from jax import lax
from jax.experimental import pallas as pl
from jax.experimental.pallas import tpu as pltpu

GRAD_CLIP = 0.01

_SMALL_FAST_PATH_ELEMS = 1 << 18   # < ~1 MiB of f32: skip Pallas, let XLA fuse
_TARGET_BLOCK_BYTES = 4 << 20      # ~4 MiB/block; x4 with in/out double buffering
_VMEM_LIMIT_BYTES = 40 << 20       # explicit scoped-VMEM limit, safe on v5e/v6e/v7x


# ----------------------------- Pallas kernel --------------------------------

def _clip_expr(g):
    # Single fused select; NaN compares False -> zeroed by the same compare.
    return jnp.where(jnp.abs(g) <= GRAD_CLIP, g, jnp.zeros((), g.dtype))


def _grad_clip_kernel(g_ref, o_ref):
    g = g_ref[...]
    o_ref[...] = jnp.where(jnp.abs(g) <= GRAD_CLIP, g, jnp.zeros((), g.dtype))


def _clip_slab(slab, tm):
    """Elementwise clip over a lane-dense (rows, lane) slab.

    The last row-block may be ragged (rows % tm != 0): Pallas pads the block
    read and masks the overhanging writes, which is safe because the kernel is
    purely elementwise.
    """
    rows, lane = slab.shape
    return pl.pallas_call(
        _grad_clip_kernel,
        out_shape=jax.ShapeDtypeStruct((rows, lane), slab.dtype),
        grid=(pl.cdiv(rows, tm),),
        in_specs=[pl.BlockSpec((tm, lane), lambda i: (i, 0))],
        out_specs=pl.BlockSpec((tm, lane), lambda i: (i, 0)),
        input_output_aliases={0: 0},
        compiler_params=pltpu.CompilerParams(
            dimension_semantics=("parallel",),
            vmem_limit_bytes=_VMEM_LIMIT_BYTES),
    )(slab)


def _clip_gradient(g):
    """Clip an arbitrarily-shaped gradient tensor (backward of GradientClip)."""
    shape, dtype = g.shape, g.dtype
    total = g.size
    if total == 0:
        return g
    if total < _SMALL_FAST_PATH_ELEMS:
        # Fast path: launch + reshape plumbing would exceed the memory time,
        # and plain jnp.where can fuse into adjacent backward ops.
        return _clip_expr(g)

    # Widest lane count that divides the tensor (>= 128 keeps stores unmasked).
    lane = 128
    for cand in (1024, 512, 256):
        if total % cand == 0:
            lane = cand
            break
    rows = total // lane
    main = rows * lane            # lane-divisible prefix (== total in common case)

    itemsize = jnp.dtype(dtype).itemsize
    sub = max(8, 32 // itemsize)  # sublane packing granularity for this dtype
    tm = max(sub, (_TARGET_BLOCK_BYTES // (lane * itemsize)) // sub * sub)
    # Keep at least 2 grid blocks when rows allow -> both v7x TCs get work.
    half_rows = pl.cdiv(pl.cdiv(rows, 2), sub) * sub
    tm = min(tm, max(sub, half_rows))

    flat = g.reshape(-1)
    if main == total:
        # Divisible case: provably zero extra HBM passes.
        return _clip_slab(flat.reshape(rows, lane), tm).reshape(shape)

    # Ragged tail (< 128 elements, only when total % 128 != 0): clip the
    # lane-divisible prefix in Pallas, the tiny tail with plain XLA, stitch.
    head = lax.slice(flat, (0,), (main,)).reshape(rows, lane)
    out_head = _clip_slab(head, tm).reshape(-1)
    out_tail = _clip_expr(lax.slice(flat, (main,), (total,)))
    return jnp.concatenate([out_head, out_tail]).reshape(shape)


# ----------------------------- custom_vjp module ----------------------------

@jax.custom_vjp
def gradient_clip(x):
    """Identity forward; gradient is clipped in backward (matches GradientClip)."""
    return x


def _gradient_clip_fwd(x):
    return x, None


def _gradient_clip_bwd(_, g):
    return (_clip_gradient(g),)


gradient_clip.defvjp(_gradient_clip_fwd, _gradient_clip_bwd)


# ----------------------------------- main -----------------------------------

def _reference_clip(g):
    zero = jnp.zeros_like(g)
    out = jnp.where(jnp.abs(g) > GRAD_CLIP, zero, g)
    return jnp.where(jnp.isnan(out), zero, out)


if __name__ == "__main__":
    # Case 1: small NCHW tensor (module's typical usage) -> fast path.
    x = jax.random.normal(jax.random.PRNGKey(0), (2, 4, 16, 16), dtype=jnp.float32)
    y = jax.block_until_ready(gradient_clip(x))
    assert y.shape == x.shape and y.dtype == x.dtype
    assert bool(jnp.array_equal(y, x))                       # forward is identity

    cot = jax.random.normal(jax.random.PRNGKey(1), x.shape, dtype=jnp.float32) * 0.02
    cot = cot.at[0, 0, 0, :4].set(jnp.nan)                   # exercise NaN zeroing
    _, vjp_fn = jax.vjp(gradient_clip, x)
    (gx,) = vjp_fn(cot)
    gx = jax.block_until_ready(gx)
    assert bool(jnp.array_equal(gx, _reference_clip(cot)))

    # Case 2: lane-divisible tensor large enough to hit the Pallas path
    # (total = 262144 -> lane = 1024, rows = 256, grid = 2 blocks).
    x2 = jax.random.normal(jax.random.PRNGKey(2), (2, 8, 128, 128), dtype=jnp.float32)
    cot2 = jax.random.normal(jax.random.PRNGKey(3), x2.shape, dtype=jnp.float32) * 0.02
    cot2 = cot2.at[0, 0, 0, :8].set(jnp.nan)
    _, vjp_fn2 = jax.vjp(gradient_clip, x2)
    (gx2,) = vjp_fn2(cot2)
    gx2 = jax.block_until_ready(gx2)
    assert bool(jnp.array_equal(gx2, _reference_clip(cot2)))

    # Case 3: ragged total (total % 128 != 0) -> Pallas prefix + XLA tail,
    # plus a masked ragged last row-block inside the grid.
    x3 = jax.random.normal(jax.random.PRNGKey(4), (2, 6, 151, 151), dtype=jnp.float32)
    cot3 = jax.random.normal(jax.random.PRNGKey(5), x3.shape, dtype=jnp.float32) * 0.02
    cot3 = cot3.at[1, 2, 7, :5].set(jnp.nan)
    _, vjp_fn3 = jax.vjp(gradient_clip, x3)
    (gx3,) = vjp_fn3(cot3)
    gx3 = jax.block_until_ready(gx3)
    assert bool(jnp.array_equal(gx3, _reference_clip(cot3)))

    print("KERNEL_OK")
</pallas_src>

<mosaic_0001>
module attributes {stable_mosaic.version = 11 : i64} {
  func.func @_grad_clip_kernel(%arg0: i32, %arg1: memref<128x1024xf32, #tpu.memory_space<vmem>>, %arg2: memref<128x1024xf32, #tpu.memory_space<vmem>>) attributes {dimension_semantics = [#tpu.dimension_semantics<parallel>], iteration_bounds = array<i64: 2>, scalar_prefetch = 0 : i64, scratch_operands = 0 : i64, tpu.core_type = #tpu.core_type<tc>, window_params = [{transform_indices = @transform_0, window_bounds = array<i64: 128, 1024>}, {transform_indices = @transform_1, window_bounds = array<i64: 128, 1024>}]} {
    %c0 = arith.constant 0 : index
    %c0_0 = arith.constant 0 : index
    %0 = vector.load %arg1[%c0, %c0_0] : memref<128x1024xf32, #tpu.memory_space<vmem>>, vector<128x1024xf32>
    %1 = math.absf %0 : vector<128x1024xf32>
    %cst = arith.constant 0.00999999977 : f32
    %2 = vector.broadcast %cst : f32 to vector<128x1024xf32>
    %3 = arith.cmpf ole, %1, %2 : vector<128x1024xf32>
    %cst_1 = arith.constant 0.000000e+00 : f32
    %4 = vector.broadcast %cst_1 : f32 to vector<128x1024xf32>
    %5 = arith.select %3, %0, %4 : vector<128x1024xi1>, vector<128x1024xf32>
    %c0_2 = arith.constant 0 : index
    %c0_3 = arith.constant 0 : index
    %6 = vector.load %arg2[%c0_2, %c0_3] : memref<128x1024xf32, #tpu.memory_space<vmem>>, vector<128x1024xf32>
    tpu.vector_store %arg2[%c0_2, %c0_3], %5 {strides = array<i32>} : memref<128x1024xf32, #tpu.memory_space<vmem>>, vector<128x1024xf32>,
    return
  }
  func.func @transform_0(%arg0: i32) -> (i32, i32) {
    %c0_i32 = arith.constant 0 : i32
    %c0_i32_0 = arith.constant 0 : i32
    return %arg0, %c0_i32 : i32, i32
  }
  func.func @transform_1(%arg0: i32) -> (i32, i32) {
    %c0_i32 = arith.constant 0 : i32
    %c0_i32_0 = arith.constant 0 : i32
    return %arg0, %c0_i32 : i32, i32
  }
}

</mosaic_0001>

<bundles_post_ra>
// kernel: tpu_custom_call.1
= control target key start
LH: loop header
LB: loop body
LE: loop exit
PB: predicated region body
PF: predicated region fallthrough
CT: control target
= control target key end

     0   :  { %6 = vsyncpa [#allocation3], 0  ;;  %s1448_s0 = inlined_call_operand.hbm [shape: f32[256,1024], index: 0, kind: input, shape index: {}, may-alias: {0,1}]   ;;  %s1449_s1 = inlined_call_operand.hbm [shape: f32[256,1024], index: 1, kind: output, shape index: {}, may-alias: {0,1}]  }
   0x1   :  { %8 = vsyncpa [#allocation3 + $0x1], 0 }
   0x2   :  { %9 = vsyncpa [#allocation4], 0 }
   0x3   :  { %11 = vsyncpa [#allocation4 + $0x1], 0  ;;  %s1052_s6 = smov 0   ;;  %s1054_s7 = smov 0  }
   0x4   :  { %s1056_s8 = smov 0   ;;  %s1058_s9 = smov 0  }
   0x5 LB: > { %s1073_s10 = sadd.s32 4294967295, %s1036_s9   ;;  %s870_s11 = sadd.s32 4294967294, %s1036_s9   ;;  %s1036_s9 = sphi %s1058_s9, %s1461_s9   ;;  %s1032_s8 = sphi %s1056_s8, %s1460_s8   ;;  %s1028_s7 = sphi %s1054_s7, %s1459_s7   ;;  %s1024_s6 = sphi %s1052_s6, %s1458_s6  }
   0x6   : > { %s1077_s12 = sadd.s32 1, %s1036_s9   ;;  %s24_s13 = sadd.s32 1, %s1032_s8 }
   0x7   : > { %s21_s14 = ssub.s32 %s1036_s9, %s1077_s12  ;;  %p31_p0 = scmp.ne.s32.totalorder %s1032_s8, %s1028_s7 }
   0x8   : > { %p22_p1 = scmp.eq.s32.totalorder %s21_s14, 0  ;;  %p32_p2 = scmp.eq.s32.totalorder %s1036_s9, 0 }
   0x9   : > { %p37_p3 = scmp.ne.s32.totalorder %s1028_s7, %s1024_s6  ;;  %p38_p4 = scmp.eq.s32.totalorder %s1073_s10, 0 }
   0xa   : > { %s1089_s15 = scalar_select %p22_p1, %s1032_s8, %s24_s13  }
   0xb   : > { %p1091_p5 = por %p32_p2, %p31_p0  ;;  %p1095_p6 = por %p38_p4, %p37_p3 }
   0xc   : > { %p61_p7 = scmp.eq.s32.totalorder %s1073_s10, 1  ;;  %p67_p8 = scmp.eq.s32.totalorder %s870_s11, 1 }
   0xd   : > { %p902_p10 = scmp.lt.s32.totalorder %s1036_s9, 2  ;;  %s87_s20 = sand.u32 1, %s1032_s8  }
   0xe   : > { %p1102_p11 = por %p61_p7, %p31_p0  ;;  %p1106_p12 = por %p67_p8, %p37_p3 }
   0xf   : > { %s887_s21 = sshll.u32 %s1036_s9, 10  ;;  %s873_s22 = sshll.u32 %s87_s20, 10 }
  0x10   : > { %s97_s25 = scalar_lea.hbm %s1448_s0, %s887_s21  ;;  %s91_s27 = scalar_lea.vmem [#allocation2], %s873_s22 }
  0x11   : > { %s98_s26 = sshll.u32 %s97_s25, 4  ;;  %s100_s28 = sshll.u32 %s91_s27, 4  ;;  %s99_s26 = int_to_ptr.hbm [resolvable:$true] %s98_s26  ;;  %s101_s28 = int_to_ptr.vmem [resolvable:$true] %s100_s28 }
  0x12   : > { %p1117_p13 = pnand %p902_p10, %p1091_p5  ;;  %p877_p0 = scmp.ge.s32.totalorder %s1036_s9, 1 }
  0x13   : > { %p108_p1 = scmp.lt.s32.totalorder %s1036_s9, 3  ;;  %s88_s30 = scalar_lea.sflag [#allocation3], %s87_s20 }
  0x14   : > { %s940_s2 = sshra.s32 %s99_s26, 4  ;;  %p944_p3 = pneg %p1117_p13  ;;  %s941_s2 = int_to_ptr.hbm [resolvable:$true] %s940_s2 }
  0x15   : > { %s942_s3 = scalar_lea.hbm %s941_s2, 1024  ;;  %s947_s11 = scalar_lea.hbm %s1448_s0, 2048 }
  0x16   : > { %p943_p2 = scmp.ne.s32.totalorder %s941_s2, %s942_s3  ;;  %p948_p5 = scmp.lt.s32.totalorder %s941_s2, %s1448_s0 }
  0x17   : > { %p949_p8 = scmp.lt.s32.totalorder %s947_s11, %s942_s3 }
  0x18   : > { %p945_p4 = pnand %p944_p3, %p943_p2 }
  0x19   : > { %p950_p10 = por %p949_p8, %p948_p5 }
  0x1a   : > { %p946_p7 = pneg %p945_p4 }
  0x1c   : > { %p951_p9 = pnand %p950_p10, %p946_p7 }
  0x1e   : > { %954 = shalt.err (!%p951_p9)
}
  0x1f   : > { %s1038_s16 = smov 1024   ;;  %s1039_s20 = smov 64  }
  0x20   : > { %897 = dma.hbm_to_vmem [thread:$0]  (!%p1117_p13), %s99_s26, 16384, %s101_s28, %s88_s30, %s1038_s16, %s1038_s16, %s1039_s20  }
  0x21   : > { %p109_p2 = pnand %p877_p0, %p108_p1 }
  0x22   : > { %s1138_s21 = sand.u32 (!%p109_p2), 1, %s1028_s7  }
  0x23   : > { %112 = sbr.rel (%p109_p2) target bundleno = 201 (0xc9), region = 24  ;;  %s878_s22 = sshll.u32 (!%p109_p2), %s1138_s21, 10 }
  0x24   : > { %s115_s23 = scalar_lea.sflag (!%p109_p2), [#allocation3], %s1138_s21  ;;  %s1142_s24 = scalar_lea.vmem (!%p109_p2), [#allocation2], %s878_s22 }
  0x28   : > { %1015 = dma.done.wait (%p1095_p6), %s115_s23, 16384  }
  0x29   : > { %1017 = vsyncadd (%p1095_p6), %s115_s23, 4294950912  ;;  %v140_v0 = vld [vmem:[%s1142_s24] sm:$0xff]  ;;  %v141_v1 = vld [vmem:[%s1142_s24 + $0x8] sm:$0xff]  ;;  %s1161_s17 = scalar_lea.vmem [#allocation5], %s878_s22  ;;  %s889_s25 = sshll.u32 %s1073_s10, 10 }
  0x2a   : > { %v142_v2 = vld [vmem:[%s1142_s24 + $0x10] sm:$0xff]  ;;  %v268_v3 = vand.u32 2147483647, %v140_v0  ;;  %v269_v4 = vand.u32 2147483647, %v141_v1  ;;  %v143_v6 = vld [vmem:[%s1142_s24 + $0x18] sm:$0xff]  ;;  %s793_s28 = scalar_lea.hbm %s1449_s1, %s889_s25 }
  0x2b   : > { %v270_v5 = vand.u32 2147483647, %v142_v2  ;;  %v144_v7 = vld [vmem:[%s1142_s24 + $0x20] sm:$0xff]  ;;  %v145_v8 = vld [vmem:[%s1142_s24 + $0x28] sm:$0xff]  ;;  %v271_v13 = vand.u32 2147483647, %v143_v6 }
  0x2c   : > { %vm396_vm0 = vcmp.le.f32.partialorder %v268_v3, 0.01  ;;  %vm397_vm1 = vcmp.le.f32.partialorder %v269_v4, 0.01  ;;  %v146_v14 = vld [vmem:[%s1142_s24 + $0x30] sm:$0xff]  ;;  %v147_v18 = vld [vmem:[%s1142_s24 + $0x38] sm:$0xff] }
  0x2d   : > { %vm1154_vm2 = vcmp.le.f32.partialorder %v270_v5, 0.01  ;;  %v524_v10 = vsel %vm396_vm0, %v140_v0, 0.0  ;;  %v525_v11 = vsel %vm397_vm1, %v141_v1, 0.0  ;;  %v272_v15 = vand.u32 2147483647, %v144_v7 }
  0x2e   : > { %v526_v12 = vsel %vm1154_vm2, %v142_v2, 0.0  ;;  %652 = vst [vmem:[%s1161_s17] sm:$0xff] %v524_v10  ;;  %v273_v16 = vand.u32 2147483647, %v145_v8  ;;  %v274_v17 = vand.u32 2147483647, %v146_v14  ;;  %v148_v19 = vld [vmem:[%s1142_s24 + $0x40] sm:$0xff] }
  0x2f   : > { %653 = vst [vmem:[%s1161_s17 + $0x8] sm:$0xff] %v525_v11  ;;  %vm399_vm3 = vcmp.le.f32.partialorder %v271_v13, 0.01  ;;  %v149_v20 = vld [vmem:[%s1142_s24 + $0x48] sm:$0xff]  ;;  %vm400_vm4 = vcmp.le.f32.partialorder %v272_v15, 0.01 }
  0x30   : > { %654 = vst [vmem:[%s1161_s17 + $0x10] sm:$0xff] %v526_v12  ;;  %v527_v21 = vsel %vm399_vm3, %v143_v6, 0.0  ;;  %vm401_vm5 = vcmp.le.f32.partialorder %v273_v16, 0.01  ;;  %v528_v22 = vsel %vm400_vm4, %v144_v7, 0.0  ;;  %v150_v24 = vld [vmem:[%s1142_s24 + $0x50] sm:$0xff] }
  0x31   : > { %655 = vst [vmem:[%s1161_s17 + $0x18] sm:$0xff] %v527_v21  ;;  %v529_v23 = vsel %vm401_vm5, %v145_v8, 0.0  ;;  %vm402_vm6 = vcmp.le.f32.partialorder %v274_v17, 0.01  ;;  %v275_v26 = vand.u32 2147483647, %v147_v18 }
  0x32   : > { %656 = vst [vmem:[%s1161_s17 + $0x20] sm:$0xff] %v528_v22  ;;  %v530_v25 = vsel %vm402_vm6, %v146_v14, 0.0  ;;  %v276_v27 = vand.u32 2147483647, %v148_v19  ;;  %v277_v28 = vand.u32 2147483647, %v149_v20 }
  0x33   : > { %657 = vst [vmem:[%s1161_s17 + $0x28] sm:$0xff] %v529_v23  ;;  %v278_v29 = vand.u32 2147483647, %v150_v24  ;;  %v151_v30 = vld [vmem:[%s1142_s24 + $0x58] sm:$0xff]  ;;  %vm403_vm7 = vcmp.le.f32.partialorder %v275_v26, 0.01 }
  0x34   : > { %658 = vst [vmem:[%s1161_s17 + $0x30] sm:$0xff] %v530_v25  ;;  %vm404_vm8 = vcmp.le.f32.partialorder %v276_v27, 0.01  ;;  %v152_v31 = vld [vmem:[%s1142_s24 + $0x60] sm:$0xff]  ;;  %v531_v32 = vsel %vm403_vm7, %v147_v18, 0.0  ;;  %v153_v37 = vld [vmem:[%s1142_s24 + $0x68] sm:$0xff] }
  0x35   : > { %v532_v33 = vsel %vm404_vm8, %v148_v19, 0.0  ;;  %vm405_vm9 = vcmp.le.f32.partialorder %v277_v28, 0.01  ;;  %vm406_vm10 = vcmp.le.f32.partialorder %v278_v29, 0.01  ;;  %659 = vst [vmem:[%s1161_s17 + $0x38] sm:$0xff] %v531_v32 }
  0x36   : > { %v533_v34 = vsel %vm405_vm9, %v149_v20, 0.0  ;;  %v534_v35 = vsel %vm406_vm10, %v150_v24, 0.0  ;;  %v279_v36 = vand.u32 2147483647, %v151_v30  ;;  %660 = vst [vmem:[%s1161_s17 + $0x40] sm:$0xff] %v532_v33  ;;  %v154_v40 = vld [vmem:[%s1142_s24 + $0x70] sm:$0xff] }
  0x37   : > { %v280_v38 = vand.u32 2147483647, %v152_v31  ;;  %v281_v39 = vand.u32 2147483647, %v153_v37  ;;  %661 = vst [vmem:[%s1161_s17 + $0x48] sm:$0xff] %v533_v34  ;;  %v155_v42 = vld [vmem:[%s1142_s24 + $0x78] sm:$0xff] }
  0x38   : > { %vm407_vm11 = vcmp.le.f32.partialorder %v279_v36, 0.01  ;;  %v282_v41 = vand.u32 2147483647, %v154_v40  ;;  %662 = vst [vmem:[%s1161_s17 + $0x50] sm:$0xff] %v534_v35  ;;  %v156_v46 = vld [vmem:[%s1142_s24 + $0x80] sm:$0xff] }
  0x39   : > { %v535_v43 = vsel %vm407_vm11, %v151_v30, 0.0  ;;  %vm408_vm12 = vcmp.le.f32.partialorder %v280_v38, 0.01  ;;  %vm409_vm13 = vcmp.le.f32.partialorder %v281_v39, 0.01  ;;  %v157_v50 = vld [vmem:[%s1142_s24 + $0x88] sm:$0xff] }
  0x3a   : > { %663 = vst [vmem:[%s1161_s17 + $0x58] sm:$0xff] %v535_v43  ;;  %v536_v44 = vsel %vm408_vm12, %v152_v31, 0.0  ;;  %v537_v45 = vsel %vm409_vm13, %v153_v37, 0.0  ;;  %vm410_vm14 = vcmp.le.f32.partialorder %v282_v41, 0.01  ;;  %v158_v51 = vld [vmem:[%s1142_s24 + $0x90] sm:$0xff] }
  0x3b   : > { %664 = vst [vmem:[%s1161_s17 + $0x60] sm:$0xff] %v536_v44  ;;  %v538_v47 = vsel %vm410_vm14, %v154_v40, 0.0  ;;  %v283_v48 = vand.u32 2147483647, %v155_v42  ;;  %v284_v49 = vand.u32 2147483647, %v156_v46 }
  0x3c   : > { %665 = vst [vmem:[%s1161_s17 + $0x68] sm:$0xff] %v537_v45  ;;  %v159_v52 = vld [vmem:[%s1142_s24 + $0x98] sm:$0xff]  ;;  %v160_v53 = vld [vmem:[%s1142_s24 + $0xa0] sm:$0xff]  ;;  %v285_v56 = vand.u32 2147483647, %v157_v50  ;;  %v161_v60 = vld [vmem:[%s1142_s24 + $0xa8] sm:$0xff] }
  0x3d   : > { %666 = vst [vmem:[%s1161_s17 + $0x70] sm:$0xff] %v538_v47  ;;  %vm411_vm15 = vcmp.le.f32.partialorder %v283_v48, 0.01  ;;  %vm412_vm0 = vcmp.le.f32.partialorder %v284_v49, 0.01  ;;  %v162_v61 = vld [vmem:[%s1142_s24 + $0xb0] sm:$0xff] }
  0x3e   : > { %v539_v54 = vsel %vm411_vm15, %v155_v42, 0.0  ;;  %v540_v55 = vsel %vm412_vm0, %v156_v46, 0.0  ;;  %v286_v57 = vand.u32 2147483647, %v158_v51  ;;  %v287_v58 = vand.u32 2147483647, %v159_v52 }
  0x3f   : > { %667 = vst [vmem:[%s1161_s17 + $0x78] sm:$0xff] %v539_v54  ;;  %v288_v59 = vand.u32 2147483647, %v160_v53  ;;  %vm413_vm1 = vcmp.le.f32.partialorder %v285_v56, 0.01  ;;  %v163_v3 = vld [vmem:[%s1142_s24 + $0xb8] sm:$0xff] }
  0x40   : > { %668 = vst [vmem:[%s1161_s17 + $0x80] sm:$0xff] %v540_v55  ;;  %vm414_vm2 = vcmp.le.f32.partialorder %v286_v57, 0.01  ;;  %v541_v62 = vsel %vm413_vm1, %v157_v50, 0.0  ;;  %vm415_vm3 = vcmp.le.f32.partialorder %v287_v58, 0.01 }
  0x41   : > { %v542_v63 = vsel %vm414_vm2, %v158_v51, 0.0  ;;  %vm416_vm4 = vcmp.le.f32.partialorder %v288_v59, 0.01  ;;  %669 = vst [vmem:[%s1161_s17 + $0x88] sm:$0xff] %v541_v62  ;;  %v543_v0 = vsel %vm415_vm3, %v159_v52, 0.0  ;;  %v164_v6 = vld [vmem:[%s1142_s24 + $0xc0] sm:$0xff] }
  0x42   : > { %v544_v1 = vsel %vm416_vm4, %v160_v53, 0.0  ;;  %v289_v2 = vand.u32 2147483647, %v161_v60  ;;  %670 = vst [vmem:[%s1161_s17 + $0x90] sm:$0xff] %v542_v63  ;;  %v290_v4 = vand.u32 2147483647, %v162_v61 }
  0x43   : > { %v291_v5 = vand.u32 2147483647, %v163_v3  ;;  %671 = vst [vmem:[%s1161_s17 + $0x98] sm:$0xff] %v543_v0  ;;  %v292_v7 = vand.u32 2147483647, %v164_v6  ;;  %v165_v8 = vld [vmem:[%s1142_s24 + $0xc8] sm:$0xff] }
  0x44   : > { %vm417_vm5 = vcmp.le.f32.partialorder %v289_v2, 0.01  ;;  %672 = vst [vmem:[%s1161_s17 + $0xa0] sm:$0xff] %v544_v1  ;;  %vm418_vm6 = vcmp.le.f32.partialorder %v290_v4, 0.01  ;;  %v166_v12 = vld [vmem:[%s1142_s24 + $0xd0] sm:$0xff] }
  0x45   : > { %v545_v9 = vsel %vm417_vm5, %v161_v60, 0.0  ;;  %vm419_vm7 = vcmp.le.f32.partialorder %v291_v5, 0.01  ;;  %v546_v10 = vsel %vm418_vm6, %v162_v61, 0.0  ;;  %vm420_vm8 = vcmp.le.f32.partialorder %v292_v7, 0.01 }
  0x46   : > { %673 = vst [vmem:[%s1161_s17 + $0xa8] sm:$0xff] %v545_v9  ;;  %v547_v11 = vsel %vm419_vm7, %v163_v3, 0.0  ;;  %v548_v13 = vsel %vm420_vm8, %v164_v6, 0.0  ;;  %v293_v14 = vand.u32 2147483647, %v165_v8  ;;  %v167_v16 = vld [vmem:[%s1142_s24 + $0xd8] sm:$0xff] }
  0x47   : > { %674 = vst [vmem:[%s1161_s17 + $0xb0] sm:$0xff] %v546_v10  ;;  %v294_v15 = vand.u32 2147483647, %v166_v12  ;;  %v168_v17 = vld [vmem:[%s1142_s24 + $0xe0] sm:$0xff]  ;;  %v169_v18 = vld [vmem:[%s1142_s24 + $0xe8] sm:$0xff]  ;;  %v170_v19 = vld [vmem:[%s1142_s24 + $0xf0] sm:$0xff] }
  0x48   : > { %675 = vst [vmem:[%s1161_s17 + $0xb8] sm:$0xff] %v547_v11  ;;  %vm421_vm9 = vcmp.le.f32.partialorder %v293_v14, 0.01  ;;  %v295_v22 = vand.u32 2147483647, %v167_v16  ;;  %v171_v26 = vld [vmem:[%s1142_s24 + $0xf8] sm:$0xff] }
  0x49   : > { %676 = vst [vmem:[%s1161_s17 + $0xc0] sm:$0xff] %v548_v13  ;;  %vm422_vm10 = vcmp.le.f32.partialorder %v294_v15, 0.01  ;;  %v549_v20 = vsel %vm421_vm9, %v165_v8, 0.0  ;;  %v296_v23 = vand.u32 2147483647, %v168_v17 }
  0x4a   : > { %v550_v21 = vsel %vm422_vm10, %v166_v12, 0.0  ;;  %677 = vst [vmem:[%s1161_s17 + $0xc8] sm:$0xff] %v549_v20  ;;  %v297_v24 = vand.u32 2147483647, %v169_v18  ;;  %v298_v25 = vand.u32 2147483647, %v170_v19 }
  0x4b   : > { %678 = vst [vmem:[%s1161_s17 + $0xd0] sm:$0xff] %v550_v21  ;;  %vm423_vm11 = vcmp.le.f32.partialorder %v295_v22, 0.01  ;;  %vm424_vm12 = vcmp.le.f32.partialorder %v296_v23, 0.01  ;;  %v172_v27 = vld [vmem:[%s1142_s24 + $0x100] sm:$0xff] }
  0x4c   : > { %v551_v28 = vsel %vm423_vm11, %v167_v16, 0.0  ;;  %v552_v29 = vsel %vm424_vm12, %v168_v17, 0.0  ;;  %vm425_vm13 = vcmp.le.f32.partialorder %v297_v24, 0.01  ;;  %vm426_vm14 = vcmp.le.f32.partialorder %v298_v25, 0.01 }
  0x4d   : > { %679 = vst [vmem:[%s1161_s17 + $0xd8] sm:$0xff] %v551_v28  ;;  %v553_v30 = vsel %vm425_vm13, %v169_v18, 0.0  ;;  %v554_v31 = vsel %vm426_vm14, %v170_v19, 0.0  ;;  %v299_v32 = vand.u32 2147483647, %v171_v26  ;;  %v173_v33 = vld [vmem:[%s1142_s24 + $0x108] sm:$0xff] }
  0x4e   : > { %680 = vst [vmem:[%s1161_s17 + $0xe0] sm:$0xff] %v552_v29  ;;  %v300_v34 = vand.u32 2147483647, %v172_v27  ;;  %v301_v35 = vand.u32 2147483647, %v173_v33  ;;  %v174_v36 = vld [vmem:[%s1142_s24 + $0x110] sm:$0xff] }
  0x4f   : > { %681 = vst [vmem:[%s1161_s17 + $0xe8] sm:$0xff] %v553_v30  ;;  %vm427_vm15 = vcmp.le.f32.partialorder %v299_v32, 0.01  ;;  %v302_v37 = vand.u32 2147483647, %v174_v36  ;;  %v175_v38 = vld [vmem:[%s1142_s24 + $0x118] sm:$0xff] }
  0x50   : > { %682 = vst [vmem:[%s1161_s17 + $0xf0] sm:$0xff] %v554_v31  ;;  %v555_v39 = vsel %vm427_vm15, %v171_v26, 0.0  ;;  %vm428_vm0 = vcmp.le.f32.partialorder %v300_v34, 0.01  ;;  %vm429_vm1 = vcmp.le.f32.partialorder %v301_v35, 0.01 }
  0x51   : > { %683 = vst [vmem:[%s1161_s17 + $0xf8] sm:$0xff] %v555_v39  ;;  %v556_v40 = vsel %vm428_vm0, %v172_v27, 0.0  ;;  %v557_v41 = vsel %vm429_vm1, %v173_v33, 0.0  ;;  %vm430_vm2 = vcmp.le.f32.partialorder %v302_v37, 0.01  ;;  %v176_v42 = vld [vmem:[%s1142_s24 + $0x120] sm:$0xff] }
  0x52   : > { %684 = vst [vmem:[%s1161_s17 + $0x100] sm:$0xff] %v556_v40  ;;  %v558_v43 = vsel %vm430_vm2, %v174_v36, 0.0  ;;  %v303_v44 = vand.u32 2147483647, %v175_v38  ;;  %v304_v45 = vand.u32 2147483647, %v176_v42 }
  0x53   : > { %685 = vst [vmem:[%s1161_s17 + $0x108] sm:$0xff] %v557_v41  ;;  %v177_v46 = vld [vmem:[%s1142_s24 + $0x128] sm:$0xff]  ;;  %v178_v47 = vld [vmem:[%s1142_s24 + $0x130] sm:$0xff]  ;;  %v179_v48 = vld [vmem:[%s1142_s24 + $0x138] sm:$0xff]  ;;  %s794_s10 = sshll.u32 %s1161_s17, 4  ;;  %s796_s29 = sshll.u32 %s793_s28, 4  ;;  %s795_s10 = int_to_ptr.vmem [resolvable:$true] %s794_s10  ;;  %s797_s29 = int_to_ptr.hbm [resolvable:$true] %s796_s29 }
  0x54   : > { %686 = vst [vmem:[%s1161_s17 + $0x110] sm:$0xff] %v558_v43  ;;  %vm431_vm3 = vcmp.le.f32.partialorder %v303_v44, 0.01  ;;  %vm432_vm4 = vcmp.le.f32.partialorder %v304_v45, 0.01  ;;  %v180_v49 = vld [vmem:[%s1142_s24 + $0x140] sm:$0xff] }
  0x55   : > { %v559_v50 = vsel %vm431_vm3, %v175_v38, 0.0  ;;  %v560_v51 = vsel %vm432_vm4, %v176_v42, 0.0  ;;  %v305_v52 = vand.u32 2147483647, %v177_v46  ;;  %v306_v53 = vand.u32 2147483647, %v178_v47 }
  0x56   : > { %687 = vst [vmem:[%s1161_s17 + $0x118] sm:$0xff] %v559_v50  ;;  %v307_v54 = vand.u32 2147483647, %v179_v48  ;;  %v308_v55 = vand.u32 2147483647, %v180_v49  ;;  %v181_v56 = vld [vmem:[%s1142_s24 + $0x148] sm:$0xff] }
  0x57   : > { %688 = vst [vmem:[%s1161_s17 + $0x120] sm:$0xff] %v560_v51  ;;  %vm433_vm5 = vcmp.le.f32.partialorder %v305_v52, 0.01  ;;  %vm434_vm6 = vcmp.le.f32.partialorder %v306_v53, 0.01  ;;  %v182_v57 = vld [vmem:[%s1142_s24 + $0x150] sm:$0xff] }
  0x58   : > { %v561_v58 = vsel %vm433_vm5, %v177_v46, 0.0  ;;  %v562_v59 = vsel %vm434_vm6, %v178_v47, 0.0  ;;  %vm435_vm7 = vcmp.le.f32.partialorder %v307_v54, 0.01  ;;  %vm436_vm8 = vcmp.le.f32.partialorder %v308_v55, 0.01 }
  0x59   : > { %689 = vst [vmem:[%s1161_s17 + $0x128] sm:$0xff] %v561_v58  ;;  %v563_v60 = vsel %vm435_vm7, %v179_v48, 0.0  ;;  %v564_v61 = vsel %vm436_vm8, %v180_v49, 0.0  ;;  %v309_v62 = vand.u32 2147483647, %v181_v56  ;;  %v183_v63 = vld [vmem:[%s1142_s24 + $0x158] sm:$0xff] }
  0x5a   : > { %690 = vst [vmem:[%s1161_s17 + $0x130] sm:$0xff] %v562_v59  ;;  %v310_v0 = vand.u32 2147483647, %v182_v57  ;;  %v311_v1 = vand.u32 2147483647, %v183_v63  ;;  %v184_v2 = vld [vmem:[%s1142_s24 + $0x160] sm:$0xff] }
  0x5b   : > { %691 = vst [vmem:[%s1161_s17 + $0x138] sm:$0xff] %v563_v60  ;;  %vm437_vm9 = vcmp.le.f32.partialorder %v309_v62, 0.01  ;;  %v312_v3 = vand.u32 2147483647, %v184_v2  ;;  %v185_v4 = vld [vmem:[%s1142_s24 + $0x168] sm:$0xff] }
  0x5c   : > { %692 = vst [vmem:[%s1161_s17 + $0x140] sm:$0xff] %v564_v61  ;;  %v565_v5 = vsel %vm437_vm9, %v181_v56, 0.0  ;;  %vm438_vm10 = vcmp.le.f32.partialorder %v310_v0, 0.01  ;;  %vm439_vm11 = vcmp.le.f32.partialorder %v311_v1, 0.01 }
  0x5d   : > { %693 = vst [vmem:[%s1161_s17 + $0x148] sm:$0xff] %v565_v5  ;;  %v566_v6 = vsel %vm438_vm10, %v182_v57, 0.0  ;;  %v567_v7 = vsel %vm439_vm11, %v183_v63, 0.0  ;;  %vm440_vm12 = vcmp.le.f32.partialorder %v312_v3, 0.01  ;;  %v186_v8 = vld [vmem:[%s1142_s24 + $0x170] sm:$0xff] }
  0x5e   : > { %694 = vst [vmem:[%s1161_s17 + $0x150] sm:$0xff] %v566_v6  ;;  %v568_v9 = vsel %vm440_vm12, %v184_v2, 0.0  ;;  %v313_v10 = vand.u32 2147483647, %v185_v4  ;;  %v314_v11 = vand.u32 2147483647, %v186_v8 }
  0x5f   : > { %695 = vst [vmem:[%s1161_s17 + $0x158] sm:$0xff] %v567_v7  ;;  %v187_v12 = vld [vmem:[%s1142_s24 + $0x178] sm:$0xff]  ;;  %v188_v13 = vld [vmem:[%s1142_s24 + $0x180] sm:$0xff]  ;;  %v189_v14 = vld [vmem:[%s1142_s24 + $0x188] sm:$0xff]  ;;  %s781_s30 = scalar_lea.sflag [#allocation4], %s1138_s21  ;;  %s984_s2 = sshra.s32 %s797_s29, 4  ;;  %s985_s2 = int_to_ptr.hbm [resolvable:$true] %s984_s2 }
  0x60   : > { %696 = vst [vmem:[%s1161_s17 + $0x160] sm:$0xff] %v568_v9  ;;  %vm441_vm13 = vcmp.le.f32.partialorder %v313_v10, 0.01  ;;  %vm442_vm14 = vcmp.le.f32.partialorder %v314_v11, 0.01  ;;  %v190_v15 = vld [vmem:[%s1142_s24 + $0x190] sm:$0xff]  ;;  %p991_p0 = scmp.lt.s32.totalorder %s985_s2, %s1449_s1 }
  0x61   : > { %v569_v16 = vsel %vm441_vm13, %v185_v4, 0.0  ;;  %v570_v17 = vsel %vm442_vm14, %v186_v8, 0.0  ;;  %v315_v18 = vand.u32 2147483647, %v187_v12  ;;  %v316_v19 = vand.u32 2147483647, %v188_v13 }
  0x62   : > { %697 = vst [vmem:[%s1161_s17 + $0x168] sm:$0xff] %v569_v16  ;;  %v317_v20 = vand.u32 2147483647, %v189_v14  ;;  %v318_v21 = vand.u32 2147483647, %v190_v15  ;;  %v191_v22 = vld [vmem:[%s1142_s24 + $0x198] sm:$0xff] }
  0x63   : > { %698 = vst [vmem:[%s1161_s17 + $0x170] sm:$0xff] %v570_v17  ;;  %vm443_vm15 = vcmp.le.f32.partialorder %v315_v18, 0.01  ;;  %vm444_vm0 = vcmp.le.f32.partialorder %v316_v19, 0.01  ;;  %v192_v23 = vld [vmem:[%s1142_s24 + $0x1a0] sm:$0xff] }
  0x64   : > { %v571_v24 = vsel %vm443_vm15, %v187_v12, 0.0  ;;  %v572_v25 = vsel %vm444_vm0, %v188_v13, 0.0  ;;  %vm445_vm1 = vcmp.le.f32.partialorder %v317_v20, 0.01  ;;  %vm446_vm2 = vcmp.le.f32.partialorder %v318_v21, 0.01 }
  0x65   : > { %699 = vst [vmem:[%s1161_s17 + $0x178] sm:$0xff] %v571_v24  ;;  %v573_v26 = vsel %vm445_vm1, %v189_v14, 0.0  ;;  %v574_v27 = vsel %vm446_vm2, %v190_v15, 0.0  ;;  %v319_v28 = vand.u32 2147483647, %v191_v22  ;;  %v193_v29 = vld [vmem:[%s1142_s24 + $0x1a8] sm:$0xff] }
  0x66   : > { %700 = vst [vmem:[%s1161_s17 + $0x180] sm:$0xff] %v572_v25  ;;  %v320_v30 = vand.u32 2147483647, %v192_v23  ;;  %v321_v31 = vand.u32 2147483647, %v193_v29  ;;  %v194_v32 = vld [vmem:[%s1142_s24 + $0x1b0] sm:$0xff] }
  0x67   : > { %701 = vst [vmem:[%s1161_s17 + $0x188] sm:$0xff] %v573_v26  ;;  %vm447_vm3 = vcmp.le.f32.partialorder %v319_v28, 0.01  ;;  %v322_v33 = vand.u32 2147483647, %v194_v32  ;;  %v195_v34 = vld [vmem:[%s1142_s24 + $0x1b8] sm:$0xff] }
  0x68   : > { %702 = vst [vmem:[%s1161_s17 + $0x190] sm:$0xff] %v574_v27  ;;  %v575_v35 = vsel %vm447_vm3, %v191_v22, 0.0  ;;  %vm448_vm4 = vcmp.le.f32.partialorder %v320_v30, 0.01  ;;  %vm449_vm5 = vcmp.le.f32.partialorder %v321_v31, 0.01 }
  0x69   : > { %703 = vst [vmem:[%s1161_s17 + $0x198] sm:$0xff] %v575_v35  ;;  %v576_v36 = vsel %vm448_vm4, %v192_v23, 0.0  ;;  %v577_v37 = vsel %vm449_vm5, %v193_v29, 0.0  ;;  %vm450_vm6 = vcmp.le.f32.partialorder %v322_v33, 0.01  ;;  %v196_v38 = vld [vmem:[%s1142_s24 + $0x1c0] sm:$0xff] }
  0x6a   : > { %704 = vst [vmem:[%s1161_s17 + $0x1a0] sm:$0xff] %v576_v36  ;;  %v578_v39 = vsel %vm450_vm6, %v194_v32, 0.0  ;;  %v323_v40 = vand.u32 2147483647, %v195_v34  ;;  %v324_v41 = vand.u32 2147483647, %v196_v38 }
  0x6b   : > { %705 = vst [vmem:[%s1161_s17 + $0x1a8] sm:$0xff] %v577_v37  ;;  %v197_v42 = vld [vmem:[%s1142_s24 + $0x1c8] sm:$0xff]  ;;  %v198_v43 = vld [vmem:[%s1142_s24 + $0x1d0] sm:$0xff]  ;;  %v199_v44 = vld [vmem:[%s1142_s24 + $0x1d8] sm:$0xff]  ;;  %s986_s3 = scalar_lea.hbm %s985_s2, 1024  ;;  %s990_s11 = scalar_lea.hbm %s1449_s1, 2048 }
  0x6c   : > { %706 = vst [vmem:[%s1161_s17 + $0x1b0] sm:$0xff] %v578_v39  ;;  %vm451_vm7 = vcmp.le.f32.partialorder %v323_v40, 0.01  ;;  %vm452_vm8 = vcmp.le.f32.partialorder %v324_v41, 0.01  ;;  %v200_v45 = vld [vmem:[%s1142_s24 + $0x1e0] sm:$0xff]  ;;  %p987_p6 = scmp.ne.s32.totalorder %s985_s2, %s986_s3  ;;  %p992_p1 = scmp.lt.s32.totalorder %s990_s11, %s986_s3 }
  0x6d   : > { %v579_v46 = vsel %vm451_vm7, %v195_v34, 0.0  ;;  %v580_v47 = vsel %vm452_vm8, %v196_v38, 0.0  ;;  %v325_v48 = vand.u32 2147483647, %v197_v42  ;;  %v326_v49 = vand.u32 2147483647, %v198_v43 }
  0x6e   : > { %707 = vst [vmem:[%s1161_s17 + $0x1b8] sm:$0xff] %v579_v46  ;;  %v327_v50 = vand.u32 2147483647, %v199_v44  ;;  %v328_v51 = vand.u32 2147483647, %v200_v45  ;;  %v201_v52 = vld [vmem:[%s1142_s24 + $0x1e8] sm:$0xff]  ;;  %p988_p9 = pnand %p987_p6, %p1102_p11  ;;  %p993_p3 = por %p992_p1, %p991_p0 }
  0x6f   : > { %708 = vst [vmem:[%s1161_s17 + $0x1c0] sm:$0xff] %v580_v47  ;;  %vm453_vm9 = vcmp.le.f32.partialorder %v325_v48, 0.01  ;;  %vm454_vm10 = vcmp.le.f32.partialorder %v326_v49, 0.01  ;;  %v202_v53 = vld [vmem:[%s1142_s24 + $0x1f0] sm:$0xff] }
  0x70   : > { %v581_v54 = vsel %vm453_vm9, %v197_v42, 0.0  ;;  %v582_v55 = vsel %vm454_vm10, %v198_v43, 0.0  ;;  %vm455_vm11 = vcmp.le.f32.partialorder %v327_v50, 0.01  ;;  %vm456_vm12 = vcmp.le.f32.partialorder %v328_v51, 0.01  ;;  %p989_p13 = pneg %p988_p9 }
  0x71   : > { %709 = vst [vmem:[%s1161_s17 + $0x1c8] sm:$0xff] %v581_v54  ;;  %v583_v56 = vsel %vm455_vm11, %v199_v44, 0.0  ;;  %v584_v57 = vsel %vm456_vm12, %v200_v45, 0.0  ;;  %v329_v58 = vand.u32 2147483647, %v201_v52  ;;  %v203_v59 = vld [vmem:[%s1142_s24 + $0x1f8] sm:$0xff] }
  0x72   : > { %710 = vst [vmem:[%s1161_s17 + $0x1d0] sm:$0xff] %v582_v55  ;;  %v330_v60 = vand.u32 2147483647, %v202_v53  ;;  %v331_v61 = vand.u32 2147483647, %v203_v59  ;;  %v204_v62 = vld [vmem:[%s1142_s24 + $0x200] sm:$0xff]  ;;  %p994_p4 = pnand %p993_p3, %p989_p13 }
  0x73   : > { %711 = vst [vmem:[%s1161_s17 + $0x1d8] sm:$0xff] %v583_v56  ;;  %vm457_vm13 = vcmp.le.f32.partialorder %v329_v58, 0.01  ;;  %v332_v63 = vand.u32 2147483647, %v204_v62  ;;  %v205_v0 = vld [vmem:[%s1142_s24 + $0x208] sm:$0xff] }
  0x74   : > { %712 = vst [vmem:[%s1161_s17 + $0x1e0] sm:$0xff] %v584_v57  ;;  %v585_v1 = vsel %vm457_vm13, %v201_v52, 0.0  ;;  %vm458_vm14 = vcmp.le.f32.partialorder %v330_v60, 0.01  ;;  %vm459_vm15 = vcmp.le.f32.partialorder %v331_v61, 0.01 }
  0x75   : > { %713 = vst [vmem:[%s1161_s17 + $0x1e8] sm:$0xff] %v585_v1  ;;  %v586_v2 = vsel %vm458_vm14, %v202_v53, 0.0  ;;  %v587_v3 = vsel %vm459_vm15, %v203_v59, 0.0  ;;  %vm460_vm0 = vcmp.le.f32.partialorder %v332_v63, 0.01  ;;  %v206_v4 = vld [vmem:[%s1142_s24 + $0x210] sm:$0xff] }
  0x76   : > { %714 = vst [vmem:[%s1161_s17 + $0x1f0] sm:$0xff] %v586_v2  ;;  %v588_v5 = vsel %vm460_vm0, %v204_v62, 0.0  ;;  %v333_v6 = vand.u32 2147483647, %v205_v0  ;;  %v334_v7 = vand.u32 2147483647, %v206_v4 }
  0x77   : > { %715 = vst [vmem:[%s1161_s17 + $0x1f8] sm:$0xff] %v587_v3  ;;  %v207_v8 = vld [vmem:[%s1142_s24 + $0x218] sm:$0xff]  ;;  %v208_v9 = vld [vmem:[%s1142_s24 + $0x220] sm:$0xff]  ;;  %v209_v10 = vld [vmem:[%s1142_s24 + $0x228] sm:$0xff] }
  0x78   : > { %716 = vst [vmem:[%s1161_s17 + $0x200] sm:$0xff] %v588_v5  ;;  %vm461_vm1 = vcmp.le.f32.partialorder %v333_v6, 0.01  ;;  %vm462_vm2 = vcmp.le.f32.partialorder %v334_v7, 0.01  ;;  %v210_v11 = vld [vmem:[%s1142_s24 + $0x230] sm:$0xff] }
  0x79   : > { %v589_v12 = vsel %vm461_vm1, %v205_v0, 0.0  ;;  %v590_v13 = vsel %vm462_vm2, %v206_v4, 0.0  ;;  %v335_v14 = vand.u32 2147483647, %v207_v8  ;;  %v336_v15 = vand.u32 2147483647, %v208_v9 }
  0x7a   : > { %717 = vst [vmem:[%s1161_s17 + $0x208] sm:$0xff] %v589_v12  ;;  %v337_v16 = vand.u32 2147483647, %v209_v10  ;;  %v338_v17 = vand.u32 2147483647, %v210_v11  ;;  %v211_v18 = vld [vmem:[%s1142_s24 + $0x238] sm:$0xff] }
  0x7b   : > { %718 = vst [vmem:[%s1161_s17 + $0x210] sm:$0xff] %v590_v13  ;;  %vm463_vm3 = vcmp.le.f32.partialorder %v335_v14, 0.01  ;;  %vm464_vm4 = vcmp.le.f32.partialorder %v336_v15, 0.01  ;;  %v212_v19 = vld [vmem:[%s1142_s24 + $0x240] sm:$0xff] }
  0x7c   : > { %v591_v20 = vsel %vm463_vm3, %v207_v8, 0.0  ;;  %v592_v21 = vsel %vm464_vm4, %v208_v9, 0.0  ;;  %vm465_vm5 = vcmp.le.f32.partialorder %v337_v16, 0.01  ;;  %vm466_vm6 = vcmp.le.f32.partialorder %v338_v17, 0.01 }
  0x7d   : > { %719 = vst [vmem:[%s1161_s17 + $0x218] sm:$0xff] %v591_v20  ;;  %v593_v22 = vsel %vm465_vm5, %v209_v10, 0.0  ;;  %v594_v23 = vsel %vm466_vm6, %v210_v11, 0.0  ;;  %v339_v24 = vand.u32 2147483647, %v211_v18  ;;  %v213_v25 = vld [vmem:[%s1142_s24 + $0x248] sm:$0xff] }
  0x7e   : > { %720 = vst [vmem:[%s1161_s17 + $0x220] sm:$0xff] %v592_v21  ;;  %v340_v26 = vand.u32 2147483647, %v212_v19  ;;  %v341_v27 = vand.u32 2147483647, %v213_v25  ;;  %v214_v28 = vld [vmem:[%s1142_s24 + $0x250] sm:$0xff] }
  0x7f   : > { %721 = vst [vmem:[%s1161_s17 + $0x228] sm:$0xff] %v593_v22  ;;  %vm467_vm7 = vcmp.le.f32.partialorder %v339_v24, 0.01  ;;  %v342_v29 = vand.u32 2147483647, %v214_v28  ;;  %v215_v30 = vld [vmem:[%s1142_s24 + $0x258] sm:$0xff] }
  0x80   : > { %722 = vst [vmem:[%s1161_s17 + $0x230] sm:$0xff] %v594_v23  ;;  %v595_v31 = vsel %vm467_vm7, %v211_v18, 0.0  ;;  %vm468_vm8 = vcmp.le.f32.partialorder %v340_v26, 0.01  ;;  %vm469_vm9 = vcmp.le.f32.partialorder %v341_v27, 0.01 }
  0x81   : > { %723 = vst [vmem:[%s1161_s17 + $0x238] sm:$0xff] %v595_v31  ;;  %v596_v32 = vsel %vm468_vm8, %v212_v19, 0.0  ;;  %v597_v33 = vsel %vm469_vm9, %v213_v25, 0.0  ;;  %vm470_vm10 = vcmp.le.f32.partialorder %v342_v29, 0.01  ;;  %v216_v34 = vld [vmem:[%s1142_s24 + $0x260] sm:$0xff] }
  0x82   : > { %724 = vst [vmem:[%s1161_s17 + $0x240] sm:$0xff] %v596_v32  ;;  %v598_v35 = vsel %vm470_vm10, %v214_v28, 0.0  ;;  %v343_v36 = vand.u32 2147483647, %v215_v30  ;;  %v344_v37 = vand.u32 2147483647, %v216_v34 }
  0x83   : > { %725 = vst [vmem:[%s1161_s17 + $0x248] sm:$0xff] %v597_v33  ;;  %v217_v38 = vld [vmem:[%s1142_s24 + $0x268] sm:$0xff]  ;;  %v218_v39 = vld [vmem:[%s1142_s24 + $0x270] sm:$0xff]  ;;  %v219_v40 = vld [vmem:[%s1142_s24 + $0x278] sm:$0xff] }
  0x84   : > { %726 = vst [vmem:[%s1161_s17 + $0x250] sm:$0xff] %v598_v35  ;;  %vm471_vm11 = vcmp.le.f32.partialorder %v343_v36, 0.01  ;;  %vm472_vm12 = vcmp.le.f32.partialorder %v344_v37, 0.01  ;;  %v220_v41 = vld [vmem:[%s1142_s24 + $0x280] sm:$0xff] }
  0x85   : > { %v599_v42 = vsel %vm471_vm11, %v215_v30, 0.0  ;;  %v600_v43 = vsel %vm472_vm12, %v216_v34, 0.0  ;;  %v345_v44 = vand.u32 2147483647, %v217_v38  ;;  %v346_v45 = vand.u32 2147483647, %v218_v39 }
  0x86   : > { %727 = vst [vmem:[%s1161_s17 + $0x258] sm:$0xff] %v599_v42  ;;  %v347_v46 = vand.u32 2147483647, %v219_v40  ;;  %v348_v47 = vand.u32 2147483647, %v220_v41  ;;  %v221_v48 = vld [vmem:[%s1142_s24 + $0x288] sm:$0xff] }
  0x87   : > { %728 = vst [vmem:[%s1161_s17 + $0x260] sm:$0xff] %v600_v43  ;;  %vm473_vm13 = vcmp.le.f32.partialorder %v345_v44, 0.01  ;;  %vm474_vm14 = vcmp.le.f32.partialorder %v346_v45, 0.01  ;;  %v222_v49 = vld [vmem:[%s1142_s24 + $0x290] sm:$0xff] }
  0x88   : > { %v601_v50 = vsel %vm473_vm13, %v217_v38, 0.0  ;;  %v602_v51 = vsel %vm474_vm14, %v218_v39, 0.0  ;;  %vm475_vm15 = vcmp.le.f32.partialorder %v347_v46, 0.01  ;;  %vm476_vm0 = vcmp.le.f32.partialorder %v348_v47, 0.01 }
  0x89   : > { %729 = vst [vmem:[%s1161_s17 + $0x268] sm:$0xff] %v601_v50  ;;  %v603_v52 = vsel %vm475_vm15, %v219_v40, 0.0  ;;  %v604_v53 = vsel %vm476_vm0, %v220_v41, 0.0  ;;  %v349_v54 = vand.u32 2147483647, %v221_v48  ;;  %v223_v55 = vld [vmem:[%s1142_s24 + $0x298] sm:$0xff] }
  0x8a   : > { %730 = vst [vmem:[%s1161_s17 + $0x270] sm:$0xff] %v602_v51  ;;  %v350_v56 = vand.u32 2147483647, %v222_v49  ;;  %v351_v57 = vand.u32 2147483647, %v223_v55  ;;  %v224_v58 = vld [vmem:[%s1142_s24 + $0x2a0] sm:$0xff] }
  0x8b   : > { %731 = vst [vmem:[%s1161_s17 + $0x278] sm:$0xff] %v603_v52  ;;  %vm477_vm1 = vcmp.le.f32.partialorder %v349_v54, 0.01  ;;  %v352_v59 = vand.u32 2147483647, %v224_v58  ;;  %v225_v60 = vld [vmem:[%s1142_s24 + $0x2a8] sm:$0xff] }
  0x8c   : > { %732 = vst [vmem:[%s1161_s17 + $0x280] sm:$0xff] %v604_v53  ;;  %v605_v61 = vsel %vm477_vm1, %v221_v48, 0.0  ;;  %vm478_vm2 = vcmp.le.f32.partialorder %v350_v56, 0.01  ;;  %vm479_vm3 = vcmp.le.f32.partialorder %v351_v57, 0.01 }
  0x8d   : > { %733 = vst [vmem:[%s1161_s17 + $0x288] sm:$0xff] %v605_v61  ;;  %v606_v62 = vsel %vm478_vm2, %v222_v49, 0.0  ;;  %v607_v63 = vsel %vm479_vm3, %v223_v55, 0.0  ;;  %vm480_vm4 = vcmp.le.f32.partialorder %v352_v59, 0.01  ;;  %v226_v0 = vld [vmem:[%s1142_s24 + $0x2b0] sm:$0xff] }
  0x8e   : > { %734 = vst [vmem:[%s1161_s17 + $0x290] sm:$0xff] %v606_v62  ;;  %v608_v1 = vsel %vm480_vm4, %v224_v58, 0.0  ;;  %v353_v2 = vand.u32 2147483647, %v225_v60  ;;  %v354_v3 = vand.u32 2147483647, %v226_v0 }
  0x8f   : > { %735 = vst [vmem:[%s1161_s17 + $0x298] sm:$0xff] %v607_v63  ;;  %v227_v4 = vld [vmem:[%s1142_s24 + $0x2b8] sm:$0xff]  ;;  %v228_v5 = vld [vmem:[%s1142_s24 + $0x2c0] sm:$0xff]  ;;  %v229_v6 = vld [vmem:[%s1142_s24 + $0x2c8] sm:$0xff] }
  0x90   : > { %736 = vst [vmem:[%s1161_s17 + $0x2a0] sm:$0xff] %v608_v1  ;;  %vm481_vm5 = vcmp.le.f32.partialorder %v353_v2, 0.01  ;;  %vm482_vm6 = vcmp.le.f32.partialorder %v354_v3, 0.01  ;;  %v230_v7 = vld [vmem:[%s1142_s24 + $0x2d0] sm:$0xff] }
  0x91   : > { %v609_v8 = vsel %vm481_vm5, %v225_v60, 0.0  ;;  %v610_v9 = vsel %vm482_vm6, %v226_v0, 0.0  ;;  %v355_v10 = vand.u32 2147483647, %v227_v4  ;;  %v356_v11 = vand.u32 2147483647, %v228_v5 }
  0x92   : > { %737 = vst [vmem:[%s1161_s17 + $0x2a8] sm:$0xff] %v609_v8  ;;  %v357_v12 = vand.u32 2147483647, %v229_v6  ;;  %v358_v13 = vand.u32 2147483647, %v230_v7  ;;  %v231_v14 = vld [vmem:[%s1142_s24 + $0x2d8] sm:$0xff] }
  0x93   : > { %738 = vst [vmem:[%s1161_s17 + $0x2b0] sm:$0xff] %v610_v9  ;;  %vm483_vm7 = vcmp.le.f32.partialorder %v355_v10, 0.01  ;;  %vm484_vm8 = vcmp.le.f32.partialorder %v356_v11, 0.01  ;;  %v232_v15 = vld [vmem:[%s1142_s24 + $0x2e0] sm:$0xff] }
  0x94   : > { %v611_v16 = vsel %vm483_vm7, %v227_v4, 0.0  ;;  %v612_v17 = vsel %vm484_vm8, %v228_v5, 0.0  ;;  %vm485_vm9 = vcmp.le.f32.partialorder %v357_v12, 0.01  ;;  %vm486_vm10 = vcmp.le.f32.partialorder %v358_v13, 0.01 }
  0x95   : > { %739 = vst [vmem:[%s1161_s17 + $0x2b8] sm:$0xff] %v611_v16  ;;  %v613_v18 = vsel %vm485_vm9, %v229_v6, 0.0  ;;  %v614_v19 = vsel %vm486_vm10, %v230_v7, 0.0  ;;  %v359_v20 = vand.u32 2147483647, %v231_v14  ;;  %v233_v21 = vld [vmem:[%s1142_s24 + $0x2e8] sm:$0xff] }
  0x96   : > { %740 = vst [vmem:[%s1161_s17 + $0x2c0] sm:$0xff] %v612_v17  ;;  %v360_v22 = vand.u32 2147483647, %v232_v15  ;;  %v361_v23 = vand.u32 2147483647, %v233_v21  ;;  %v234_v24 = vld [vmem:[%s1142_s24 + $0x2f0] sm:$0xff] }
  0x97   : > { %741 = vst [vmem:[%s1161_s17 + $0x2c8] sm:$0xff] %v613_v18  ;;  %vm487_vm11 = vcmp.le.f32.partialorder %v359_v20, 0.01  ;;  %v362_v25 = vand.u32 2147483647, %v234_v24  ;;  %v235_v26 = vld [vmem:[%s1142_s24 + $0x2f8] sm:$0xff] }
  0x98   : > { %742 = vst [vmem:[%s1161_s17 + $0x2d0] sm:$0xff] %v614_v19  ;;  %v615_v27 = vsel %vm487_vm11, %v231_v14, 0.0  ;;  %vm488_vm12 = vcmp.le.f32.partialorder %v360_v22, 0.01  ;;  %vm489_vm13 = vcmp.le.f32.partialorder %v361_v23, 0.01 }
  0x99   : > { %743 = vst [vmem:[%s1161_s17 + $0x2d8] sm:$0xff] %v615_v27  ;;  %v616_v28 = vsel %vm488_vm12, %v232_v15, 0.0  ;;  %v617_v29 = vsel %vm489_vm13, %v233_v21, 0.0  ;;  %vm490_vm14 = vcmp.le.f32.partialorder %v362_v25, 0.01  ;;  %v236_v30 = vld [vmem:[%s1142_s24 + $0x300] sm:$0xff] }
  0x9a   : > { %744 = vst [vmem:[%s1161_s17 + $0x2e0] sm:$0xff] %v616_v28  ;;  %v618_v31 = vsel %vm490_vm14, %v234_v24, 0.0  ;;  %v363_v32 = vand.u32 2147483647, %v235_v26  ;;  %v364_v33 = vand.u32 2147483647, %v236_v30 }
  0x9b   : > { %745 = vst [vmem:[%s1161_s17 + $0x2e8] sm:$0xff] %v617_v29  ;;  %v237_v34 = vld [vmem:[%s1142_s24 + $0x308] sm:$0xff]  ;;  %v238_v35 = vld [vmem:[%s1142_s24 + $0x310] sm:$0xff]  ;;  %v239_v36 = vld [vmem:[%s1142_s24 + $0x318] sm:$0xff] }
  0x9c   : > { %746 = vst [vmem:[%s1161_s17 + $0x2f0] sm:$0xff] %v618_v31  ;;  %vm491_vm15 = vcmp.le.f32.partialorder %v363_v32, 0.01  ;;  %vm492_vm0 = vcmp.le.f32.partialorder %v364_v33, 0.01  ;;  %v240_v37 = vld [vmem:[%s1142_s24 + $0x320] sm:$0xff] }
  0x9d   : > { %v619_v38 = vsel %vm491_vm15, %v235_v26, 0.0  ;;  %v620_v39 = vsel %vm492_vm0, %v236_v30, 0.0  ;;  %v365_v40 = vand.u32 2147483647, %v237_v34  ;;  %v366_v41 = vand.u32 2147483647, %v238_v35 }
  0x9e   : > { %747 = vst [vmem:[%s1161_s17 + $0x2f8] sm:$0xff] %v619_v38  ;;  %v367_v42 = vand.u32 2147483647, %v239_v36  ;;  %v368_v43 = vand.u32 2147483647, %v240_v37  ;;  %v241_v44 = vld [vmem:[%s1142_s24 + $0x328] sm:$0xff] }
  0x9f   : > { %748 = vst [vmem:[%s1161_s17 + $0x300] sm:$0xff] %v620_v39  ;;  %vm493_vm1 = vcmp.le.f32.partialorder %v365_v40, 0.01  ;;  %vm494_vm2 = vcmp.le.f32.partialorder %v366_v41, 0.01  ;;  %v242_v45 = vld [vmem:[%s1142_s24 + $0x330] sm:$0xff] }
  0xa0   : > { %v621_v46 = vsel %vm493_vm1, %v237_v34, 0.0  ;;  %v622_v47 = vsel %vm494_vm2, %v238_v35, 0.0  ;;  %vm495_vm3 = vcmp.le.f32.partialorder %v367_v42, 0.01  ;;  %vm496_vm4 = vcmp.le.f32.partialorder %v368_v43, 0.01 }
  0xa1   : > { %749 = vst [vmem:[%s1161_s17 + $0x308] sm:$0xff] %v621_v46  ;;  %v623_v48 = vsel %vm495_vm3, %v239_v36, 0.0  ;;  %v624_v49 = vsel %vm496_vm4, %v240_v37, 0.0  ;;  %v369_v50 = vand.u32 2147483647, %v241_v44  ;;  %v243_v51 = vld [vmem:[%s1142_s24 + $0x338] sm:$0xff] }
  0xa2   : > { %750 = vst [vmem:[%s1161_s17 + $0x310] sm:$0xff] %v622_v47  ;;  %v370_v52 = vand.u32 2147483647, %v242_v45  ;;  %v371_v53 = vand.u32 2147483647, %v243_v51  ;;  %v244_v54 = vld [vmem:[%s1142_s24 + $0x340] sm:$0xff] }
  0xa3   : > { %751 = vst [vmem:[%s1161_s17 + $0x318] sm:$0xff] %v623_v48  ;;  %vm497_vm5 = vcmp.le.f32.partialorder %v369_v50, 0.01  ;;  %v372_v55 = vand.u32 2147483647, %v244_v54  ;;  %v245_v56 = vld [vmem:[%s1142_s24 + $0x348] sm:$0xff] }
  0xa4   : > { %752 = vst [vmem:[%s1161_s17 + $0x320] sm:$0xff] %v624_v49  ;;  %v625_v57 = vsel %vm497_vm5, %v241_v44, 0.0  ;;  %vm498_vm6 = vcmp.le.f32.partialorder %v370_v52, 0.01  ;;  %vm499_vm7 = vcmp.le.f32.partialorder %v371_v53, 0.01 }
  0xa5   : > { %753 = vst [vmem:[%s1161_s17 + $0x328] sm:$0xff] %v625_v57  ;;  %v626_v58 = vsel %vm498_vm6, %v242_v45, 0.0  ;;  %v627_v59 = vsel %vm499_vm7, %v243_v51, 0.0  ;;  %vm500_vm8 = vcmp.le.f32.partialorder %v372_v55, 0.01  ;;  %v246_v60 = vld [vmem:[%s1142_s24 + $0x350] sm:$0xff] }
  0xa6   : > { %754 = vst [vmem:[%s1161_s17 + $0x330] sm:$0xff] %v626_v58  ;;  %v628_v61 = vsel %vm500_vm8, %v244_v54, 0.0  ;;  %v373_v62 = vand.u32 2147483647, %v245_v56  ;;  %v374_v63 = vand.u32 2147483647, %v246_v60 }
  0xa7   : > { %755 = vst [vmem:[%s1161_s17 + $0x338] sm:$0xff] %v627_v59  ;;  %v247_v0 = vld [vmem:[%s1142_s24 + $0x358] sm:$0xff]  ;;  %v248_v1 = vld [vmem:[%s1142_s24 + $0x360] sm:$0xff]  ;;  %v249_v2 = vld [vmem:[%s1142_s24 + $0x368] sm:$0xff] }
  0xa8   : > { %756 = vst [vmem:[%s1161_s17 + $0x340] sm:$0xff] %v628_v61  ;;  %vm501_vm9 = vcmp.le.f32.partialorder %v373_v62, 0.01  ;;  %vm502_vm10 = vcmp.le.f32.partialorder %v374_v63, 0.01  ;;  %v250_v3 = vld [vmem:[%s1142_s24 + $0x370] sm:$0xff] }
  0xa9   : > { %v629_v4 = vsel %vm501_vm9, %v245_v56, 0.0  ;;  %v630_v5 = vsel %vm502_vm10, %v246_v60, 0.0  ;;  %v375_v6 = vand.u32 2147483647, %v247_v0  ;;  %v376_v7 = vand.u32 2147483647, %v248_v1 }
  0xaa   : > { %757 = vst [vmem:[%s1161_s17 + $0x348] sm:$0xff] %v629_v4  ;;  %v377_v8 = vand.u32 2147483647, %v249_v2  ;;  %v378_v9 = vand.u32 2147483647, %v250_v3  ;;  %v251_v10 = vld [vmem:[%s1142_s24 + $0x378] sm:$0xff] }
  0xab   : > { %758 = vst [vmem:[%s1161_s17 + $0x350] sm:$0xff] %v630_v5  ;;  %vm503_vm11 = vcmp.le.f32.partialorder %v375_v6, 0.01  ;;  %vm504_vm12 = vcmp.le.f32.partialorder %v376_v7, 0.01  ;;  %v252_v11 = vld [vmem:[%s1142_s24 + $0x380] sm:$0xff] }
  0xac   : > { %v631_v12 = vsel %vm503_vm11, %v247_v0, 0.0  ;;  %v632_v13 = vsel %vm504_vm12, %v248_v1, 0.0  ;;  %vm505_vm13 = vcmp.le.f32.partialorder %v377_v8, 0.01  ;;  %vm506_vm14 = vcmp.le.f32.partialorder %v378_v9, 0.01 }
  0xad   : > { %759 = vst [vmem:[%s1161_s17 + $0x358] sm:$0xff] %v631_v12  ;;  %v633_v14 = vsel %vm505_vm13, %v249_v2, 0.0  ;;  %v634_v15 = vsel %vm506_vm14, %v250_v3, 0.0  ;;  %v379_v16 = vand.u32 2147483647, %v251_v10  ;;  %v253_v17 = vld [vmem:[%s1142_s24 + $0x388] sm:$0xff] }
  0xae   : > { %760 = vst [vmem:[%s1161_s17 + $0x360] sm:$0xff] %v632_v13  ;;  %v380_v18 = vand.u32 2147483647, %v252_v11  ;;  %v381_v19 = vand.u32 2147483647, %v253_v17  ;;  %v254_v20 = vld [vmem:[%s1142_s24 + $0x390] sm:$0xff] }
  0xaf   : > { %761 = vst [vmem:[%s1161_s17 + $0x368] sm:$0xff] %v633_v14  ;;  %vm507_vm15 = vcmp.le.f32.partialorder %v379_v16, 0.01  ;;  %v382_v21 = vand.u32 2147483647, %v254_v20  ;;  %v255_v22 = vld [vmem:[%s1142_s24 + $0x398] sm:$0xff] }
  0xb0   : > { %762 = vst [vmem:[%s1161_s17 + $0x370] sm:$0xff] %v634_v15  ;;  %v635_v23 = vsel %vm507_vm15, %v251_v10, 0.0  ;;  %vm508_vm0 = vcmp.le.f32.partialorder %v380_v18, 0.01  ;;  %vm509_vm1 = vcmp.le.f32.partialorder %v381_v19, 0.01 }
  0xb1   : > { %763 = vst [vmem:[%s1161_s17 + $0x378] sm:$0xff] %v635_v23  ;;  %v636_v24 = vsel %vm508_vm0, %v252_v11, 0.0  ;;  %v637_v25 = vsel %vm509_vm1, %v253_v17, 0.0  ;;  %vm510_vm2 = vcmp.le.f32.partialorder %v382_v21, 0.01  ;;  %v256_v26 = vld [vmem:[%s1142_s24 + $0x3a0] sm:$0xff] }
  0xb2   : > { %764 = vst [vmem:[%s1161_s17 + $0x380] sm:$0xff] %v636_v24  ;;  %v638_v27 = vsel %vm510_vm2, %v254_v20, 0.0  ;;  %v383_v28 = vand.u32 2147483647, %v255_v22  ;;  %v384_v29 = vand.u32 2147483647, %v256_v26 }
  0xb3   : > { %765 = vst [vmem:[%s1161_s17 + $0x388] sm:$0xff] %v637_v25  ;;  %v257_v30 = vld [vmem:[%s1142_s24 + $0x3a8] sm:$0xff]  ;;  %v258_v31 = vld [vmem:[%s1142_s24 + $0x3b0] sm:$0xff]  ;;  %v259_v32 = vld [vmem:[%s1142_s24 + $0x3b8] sm:$0xff] }
  0xb4   : > { %766 = vst [vmem:[%s1161_s17 + $0x390] sm:$0xff] %v638_v27  ;;  %vm511_vm3 = vcmp.le.f32.partialorder %v383_v28, 0.01  ;;  %vm512_vm4 = vcmp.le.f32.partialorder %v384_v29, 0.01  ;;  %v260_v33 = vld [vmem:[%s1142_s24 + $0x3c0] sm:$0xff] }
  0xb5   : > { %v639_v34 = vsel %vm511_vm3, %v255_v22, 0.0  ;;  %v640_v35 = vsel %vm512_vm4, %v256_v26, 0.0  ;;  %v385_v36 = vand.u32 2147483647, %v257_v30  ;;  %v386_v37 = vand.u32 2147483647, %v258_v31 }
  0xb6   : > { %767 = vst [vmem:[%s1161_s17 + $0x398] sm:$0xff] %v639_v34  ;;  %v387_v38 = vand.u32 2147483647, %v259_v32  ;;  %v388_v39 = vand.u32 2147483647, %v260_v33  ;;  %v261_v40 = vld [vmem:[%s1142_s24 + $0x3c8] sm:$0xff] }
  0xb7   : > { %768 = vst [vmem:[%s1161_s17 + $0x3a0] sm:$0xff] %v640_v35  ;;  %vm513_vm5 = vcmp.le.f32.partialorder %v385_v36, 0.01  ;;  %vm514_vm6 = vcmp.le.f32.partialorder %v386_v37, 0.01  ;;  %v262_v41 = vld [vmem:[%s1142_s24 + $0x3d0] sm:$0xff] }
  0xb8   : > { %v641_v42 = vsel %vm513_vm5, %v257_v30, 0.0  ;;  %v642_v43 = vsel %vm514_vm6, %v258_v31, 0.0  ;;  %vm515_vm7 = vcmp.le.f32.partialorder %v387_v38, 0.01  ;;  %vm516_vm8 = vcmp.le.f32.partialorder %v388_v39, 0.01 }
  0xb9   : > { %769 = vst [vmem:[%s1161_s17 + $0x3a8] sm:$0xff] %v641_v42  ;;  %v643_v44 = vsel %vm515_vm7, %v259_v32, 0.0  ;;  %v644_v45 = vsel %vm516_vm8, %v260_v33, 0.0  ;;  %v389_v46 = vand.u32 2147483647, %v261_v40  ;;  %v263_v47 = vld [vmem:[%s1142_s24 + $0x3d8] sm:$0xff] }
  0xba   : > { %770 = vst [vmem:[%s1161_s17 + $0x3b0] sm:$0xff] %v642_v43  ;;  %v390_v48 = vand.u32 2147483647, %v262_v41  ;;  %v391_v49 = vand.u32 2147483647, %v263_v47  ;;  %v264_v50 = vld [vmem:[%s1142_s24 + $0x3e0] sm:$0xff] }
  0xbb   : > { %771 = vst [vmem:[%s1161_s17 + $0x3b8] sm:$0xff] %v643_v44  ;;  %vm517_vm9 = vcmp.le.f32.partialorder %v389_v46, 0.01  ;;  %v392_v51 = vand.u32 2147483647, %v264_v50  ;;  %v265_v52 = vld [vmem:[%s1142_s24 + $0x3e8] sm:$0xff] }
  0xbc   : > { %772 = vst [vmem:[%s1161_s17 + $0x3c0] sm:$0xff] %v644_v45  ;;  %v645_v53 = vsel %vm517_vm9, %v261_v40, 0.0  ;;  %vm518_vm10 = vcmp.le.f32.partialorder %v390_v48, 0.01  ;;  %vm519_vm11 = vcmp.le.f32.partialorder %v391_v49, 0.01 }
  0xbd   : > { %773 = vst [vmem:[%s1161_s17 + $0x3c8] sm:$0xff] %v645_v53  ;;  %v646_v54 = vsel %vm518_vm10, %v262_v41, 0.0  ;;  %v647_v55 = vsel %vm519_vm11, %v263_v47, 0.0  ;;  %vm520_vm12 = vcmp.le.f32.partialorder %v392_v51, 0.01  ;;  %v266_v56 = vld [vmem:[%s1142_s24 + $0x3f0] sm:$0xff] }
  0xbe   : > { %774 = vst [vmem:[%s1161_s17 + $0x3d0] sm:$0xff] %v646_v54  ;;  %v648_v57 = vsel %vm520_vm12, %v264_v50, 0.0  ;;  %v393_v58 = vand.u32 2147483647, %v265_v52  ;;  %v394_v59 = vand.u32 2147483647, %v266_v56 }
  0xbf   : > { %775 = vst [vmem:[%s1161_s17 + $0x3d8] sm:$0xff] %v647_v55  ;;  %v267_v60 = vld [vmem:[%s1142_s24 + $0x3f8] sm:$0xff] }
  0xc0   : > { %776 = vst [vmem:[%s1161_s17 + $0x3e0] sm:$0xff] %v648_v57  ;;  %vm521_vm13 = vcmp.le.f32.partialorder %v393_v58, 0.01  ;;  %vm522_vm14 = vcmp.le.f32.partialorder %v394_v59, 0.01 }
  0xc1   : > { %v649_v61 = vsel %vm521_vm13, %v265_v52, 0.0  ;;  %v650_v62 = vsel %vm522_vm14, %v266_v56, 0.0  ;;  %v395_v63 = vand.u32 2147483647, %v267_v60 }
  0xc2   : > { %777 = vst [vmem:[%s1161_s17 + $0x3e8] sm:$0xff] %v649_v61 }
  0xc3   : > { %778 = vst [vmem:[%s1161_s17 + $0x3f0] sm:$0xff] %v650_v62  ;;  %vm523_vm15 = vcmp.le.f32.partialorder %v395_v63, 0.01 }
  0xc4   : > { %v651_v0 = vsel %vm523_vm15, %v267_v60, 0.0 }
  0xc5   : > { %779 = vst [vmem:[%s1161_s17 + $0x3f8] sm:$0xff] %v651_v0 }
  0xc6   : > { %997 = shalt.err (!%p994_p4)
}
  0xc7   : > { %s1040_s16 = smov 1024   ;;  %s1041_s20 = smov 64  }
  0xc8   : > { %892 = dma.vmem_to_hbm [thread:$0]  (%p1102_p11), %s795_s10, 16384, %s797_s29, %s781_s30, %s1040_s16, %s1040_s16, %s1041_s20  }
  0xc9 PF: > { %s811_s21 = sand.u32 1, %s1024_s6   ;;  %p1457_p7 = scmp.ge.s32.totalorder %s1036_s9, 2 }
  0xca   : > { %s812_s22 = scalar_lea.sflag [#allocation4], %s811_s21 }
  0xcb   : > { %p899_p5 = pnand %p1457_p7, %p1106_p12 }
  0xcd   : > { %p900_p8 = pneg %p899_p5 }
  0xcf   : > { %1019 = dma.done.wait (%p900_p8), %s812_s22, 16384  }
  0xd0   : > { %1021 = vsyncadd (%p900_p8), %s812_s22, 4294950912  ;;  %p14_p10 = scmp.ge.s32.totalorder %s1077_s12, 4   ;;  %s1458_s6 = smov %s1028_s7 }
  0xd1   : > { %s1459_s7 = smov %s1032_s8  ;;  %s1460_s8 = smov %s1089_s15 }
  0xd2   : > { %s1461_s9 = smov %s1077_s12  ;;  %16 = sbr.rel (!%p14_p10) target bundleno = 5 (0x5), region = 69 }
  0xd7   :  { %818 = vsyncpa [#allocation3], 1 }
  0xd8   :  { %820 = vsyncpa [#allocation3 + $0x1], 1 }
  0xd9   :  { %821 = vsyncpa [#allocation4], 1 }
  0xda   :  { %823 = vsyncpa [#allocation4 + $0x1], 1 }

</bundles_post_ra>
